<compile_context>
chip_gen: v5e
topology: v5e:2x2
jax: 0.10.0
libtpu: 0.0.40
codegen_flags: <defaults>
</compile_context>

<pallas_src>
import functools

import jax
import jax.numpy as jnp
from jax import lax
from jax.experimental import pallas as pl
from jax.experimental.pallas import tpu as pltpu


def _l2_loss_kernel(p_ref, g_ref, o_ref, *, tile_rows, chunk_rows, inner,
                    n_rows, lane, need_mask):
    c = pl.program_id(0)
    i = pl.program_id(1)

    @pl.when(i == 0)
    def _():
        o_ref[...] = jnp.zeros_like(o_ref)

    n_chunks = tile_rows // chunk_rows
    row0 = (c * inner + i) * tile_rows

    def accum(k, masked):
        start = k * chunk_rows
        if not isinstance(start, int):
            start = pl.multiple_of(start, chunk_rows)
        # Per-chunk upcast to f32; temporaries are chunk-sized, not tile-sized.
        d = (p_ref[pl.ds(start, chunk_rows), :].astype(jnp.float32)
             - g_ref[pl.ds(start, chunk_rows), :].astype(jnp.float32))
        sq = d * d
        if masked:
            rid = (row0 + start
                   + jax.lax.broadcasted_iota(jnp.int32, (chunk_rows, 1), 0))
            sq = jnp.where(rid < n_rows, sq, jnp.float32(0.0))
        # Sublane-group reduce (pure VPU adds) into the VMEM-resident
        # (8, lane) accumulator block.
        o_ref[...] += sq.reshape(chunk_rows // 8, 8, lane).sum(axis=0)

    def run_chunks(masked):
        if n_chunks == 1:
            accum(0, masked)
        else:
            def body(k, carry):
                accum(k, masked)
                return carry
            lax.fori_loop(0, n_chunks, body, 0)

    if need_mask:
        # Only the ragged boundary block (and any clamped phantom block) pays
        # for the iota/compare/where; interior tiles run the plain path.
        is_interior = row0 + tile_rows <= n_rows

        @pl.when(is_interior)
        def _():
            run_chunks(False)

        @pl.when(jnp.logical_not(is_interior))
        def _():
            run_chunks(True)
    else:
        run_chunks(False)


def _sublane_multiple(dtype):
    # Native sublane packing: 8 rows for 4-byte dtypes, 16 for 2-byte,
    # 32 for 1-byte (int8/fp8).
    return max(8, 32 // jnp.dtype(dtype).itemsize)


def l2_loss(preds, gts, *, block_bytes=4 << 20):
    """mean((preds - gts) ** 2) computed with a Pallas TPU kernel."""
    assert preds.shape == gts.shape
    n = preds.size
    pf = preds.reshape(-1)   # native dtype; per-chunk upcast to f32 in-kernel
    gf = gts.reshape(-1)
    inv_n = jnp.float32(1.0 / n)

    # Lane-dense last dim: prefer wider when it divides n (bigger unmasked
    # stores / DMA bursts), else 128.
    lane = 128
    for cand in (1024, 512, 256):
        if n % cand == 0 and n // cand >= 8:
            lane = cand
            break

    rows = n // lane
    rem = n - rows * lane

    # Tiny tail (< lane elements, only when n is not lane-aligned): plain jnp,
    # no full-array padding copy.
    if rem:
        td = (pf[rows * lane:].astype(jnp.float32)
              - gf[rows * lane:].astype(jnp.float32))
        tail = jnp.sum(td * td)
    else:
        tail = jnp.float32(0.0)

    if rows == 0:
        # Degenerate tiny input: nothing lane-aligned for the kernel to do.
        return tail * inv_n

    p2 = (pf[: rows * lane] if rem else pf).reshape(rows, lane)
    g2 = (gf[: rows * lane] if rem else gf).reshape(rows, lane)

    itemsize = max(preds.dtype.itemsize, gts.dtype.itemsize)
    sub = max(_sublane_multiple(preds.dtype), _sublane_multiple(gts.dtype))

    # In-kernel accumulation chunk: ~256 KiB of f32 temporaries per chunk so
    # intermediates never scale with the (large) DMA block.
    chunk_rows = max(sub, ((256 << 10) // (lane * 4)) // sub * sub)

    rows_padded = pl.cdiv(rows, sub) * sub
    if rows_padded <= chunk_rows:
        # Small input: single chunk == single block.
        chunk_rows = rows_padded
        tile_rows = rows_padded
    else:
        # ~block_bytes per input per block (double-buffered by the pipeline),
        # rounded to a whole number of chunks.
        max_tile_rows = max(
            chunk_rows,
            (block_bytes // (lane * itemsize)) // chunk_rows * chunk_rows)
        tile_rows = min(max_tile_rows,
                        pl.cdiv(rows, chunk_rows) * chunk_rows)

    total_blocks = pl.cdiv(rows, tile_rows)
    # Leading "parallel" axis -> independent per-core partial sums so v7x's
    # two TensorCores each reduce half the blocks (harmless sequential split
    # on single-core v5e/v6e). If profiling shows v7x does not shard this
    # axis, switch to an explicit pl.core_map split.
    n_par = 2 if total_blocks >= 2 else 1

    if n_par > 1 and total_blocks % n_par != 0:
        # Nudge tile_rows down so n_par divides the block count exactly,
        # removing a duplicated (clamped) block read and the per-step min().
        target = pl.cdiv(total_blocks, n_par) * n_par
        cand = pl.cdiv(pl.cdiv(rows, target), chunk_rows) * chunk_rows
        if cand >= chunk_rows and pl.cdiv(rows, cand) % n_par == 0:
            tile_rows = cand
            total_blocks = pl.cdiv(rows, tile_rows)

    inner = pl.cdiv(total_blocks, n_par)
    need_mask = (n_par * inner * tile_rows) != rows

    if n_par * inner == total_blocks:
        def in_map(c, i):
            return (c * inner + i, 0)
    else:
        last = total_blocks - 1

        def in_map(c, i):
            # Clamped phantom block; its rows are fully masked in-kernel.
            return (jnp.minimum(c * inner + i, last), 0)

    kernel = functools.partial(
        _l2_loss_kernel,
        tile_rows=tile_rows, chunk_rows=chunk_rows, inner=inner,
        n_rows=rows, lane=lane, need_mask=need_mask)

    # VMEM budget: 2 inputs x 2 pipeline buffers x block + per-chunk f32
    # temporaries + accumulator buffers + margin (clamped well under v7x's
    # 64 MiB physical VMEM).
    in_block_bytes = tile_rows * lane * itemsize
    vmem_needed = (2 * 2 * in_block_bytes
                   + 8 * chunk_rows * lane * 4
                   + 2 * n_par * 8 * lane * 4
                   + (4 << 20))
    vmem_limit = int(min(48 << 20, max(32 << 20, vmem_needed)))

    cost = pl.CostEstimate(
        flops=3 * n,                 # sub, mul, add per element
        transcendentals=0,
        bytes_accessed=2 * n * itemsize + n_par * 8 * lane * 4)

    partials = pl.pallas_call(
        kernel,
        out_shape=jax.ShapeDtypeStruct((n_par * 8, lane), jnp.float32),
        grid_spec=pltpu.PrefetchScalarGridSpec(
            num_scalar_prefetch=0,
            grid=(n_par, inner),
            in_specs=[
                pl.BlockSpec((tile_rows, lane), in_map),
                pl.BlockSpec((tile_rows, lane), in_map),
            ],
            out_specs=pl.BlockSpec((8, lane), lambda c, i: (c, 0)),
        ),
        compiler_params=pltpu.CompilerParams(
            dimension_semantics=("parallel", "arbitrary"),
            vmem_limit_bytes=vmem_limit),
        cost_estimate=cost,
    )(p2, g2)

    # Single cross-lane reduce + constant multiply (no divide) at the end.
    return (jnp.sum(partials) + tail) * inv_n


if __name__ == "__main__":
    key = jax.random.PRNGKey(0)
    k1, k2 = jax.random.split(key)
    preds = jax.random.normal(k1, (2, 4, 16, 16), dtype=jnp.float32)
    gts = jax.random.normal(k2, (2, 4, 16, 16), dtype=jnp.float32)

    loss = jax.block_until_ready(l2_loss(preds, gts))

    # Reference check (plain JAX).
    ref = jnp.mean((preds - gts) ** 2)
    assert jnp.allclose(loss, ref, rtol=1e-5, atol=1e-6), (loss, ref)

    print("KERNEL_OK")
</pallas_src>

<mosaic_0001>
module attributes {stable_mosaic.version = 11 : i64} {
  func.func @_l2_loss_kernel(%arg0: i32, %arg1: i32, %arg2: memref<8x256xf32, #tpu.memory_space<vmem>>, %arg3: memref<8x256xf32, #tpu.memory_space<vmem>>, %arg4: memref<8x256xf32, #tpu.memory_space<vmem>>) attributes {dimension_semantics = [#tpu.dimension_semantics<parallel>, #tpu.dimension_semantics<arbitrary>], iteration_bounds = array<i64: 1, 1>, scalar_prefetch = 0 : i64, scratch_operands = 0 : i64, tpu.core_type = #tpu.core_type<tc>, window_params = [{transform_indices = @transform_0, window_bounds = array<i64: 8, 256>}, {transform_indices = @transform_1, window_bounds = array<i64: 8, 256>}, {transform_indices = @transform_2, window_bounds = array<i64: 8, 256>}]} {
    %c0_i32 = arith.constant 0 : i32
    %0 = arith.cmpi eq, %arg1, %c0_i32 : i32
    %1 = arith.extui %0 : i1 to i32
    %c0_i32_0 = arith.constant 0 : i32
    %2 = arith.cmpi ne, %1, %c0_i32_0 : i32
    scf.if %2 {
      %cst_8 = arith.constant 0.000000e+00 : f32
      %12 = vector.broadcast %cst_8 : f32 to vector<8x256xf32>
      %c0_9 = arith.constant 0 : index
      %c0_10 = arith.constant 0 : index
      %13 = vector.load %arg4[%c0_9, %c0_10] : memref<8x256xf32, #tpu.memory_space<vmem>>, vector<8x256xf32>
      tpu.vector_store %arg4[%c0_9, %c0_10], %12 {strides = array<i32>} : memref<8x256xf32, #tpu.memory_space<vmem>>, vector<8x256xf32>,
    } else {
    }
    %c0 = arith.constant 0 : index
    %c0_1 = arith.constant 0 : index
    %3 = vector.load %arg2[%c0, %c0_1] : memref<8x256xf32, #tpu.memory_space<vmem>>, vector<8x256xf32>
    %c0_2 = arith.constant 0 : index
    %c0_3 = arith.constant 0 : index
    %4 = vector.load %arg3[%c0_2, %c0_3] : memref<8x256xf32, #tpu.memory_space<vmem>>, vector<8x256xf32>
    %5 = arith.subf %3, %4 : vector<8x256xf32>
    %6 = arith.mulf %5, %5 : vector<8x256xf32>
    %c0_4 = arith.constant 0 : index
    %c0_5 = arith.constant 0 : index
    %7 = vector.load %arg4[%c0_4, %c0_5] : memref<8x256xf32, #tpu.memory_space<vmem>>, vector<8x256xf32>
    %8 = vector.shape_cast %6 : vector<8x256xf32> to vector<1x8x256xf32>
    %cst = arith.constant dense<0.000000e+00> : vector<8x256xf32>
    %9 = vector.multi_reduction <add>, %8, %cst [0] : vector<1x8x256xf32> to vector<8x256xf32>
    %10 = arith.addf %7, %9 : vector<8x256xf32>
    %c0_6 = arith.constant 0 : index
    %c0_7 = arith.constant 0 : index
    %11 = vector.load %arg4[%c0_6, %c0_7] : memref<8x256xf32, #tpu.memory_space<vmem>>, vector<8x256xf32>
    tpu.vector_store %arg4[%c0_6, %c0_7], %10 {strides = array<i32>} : memref<8x256xf32, #tpu.memory_space<vmem>>, vector<8x256xf32>,
    return
  }
  func.func @transform_0(%arg0: i32, %arg1: i32) -> (i32, i32) {
    %c1_i32 = arith.constant 1 : i32
    %0 = arith.muli %arg0, %c1_i32 : i32
    %1 = arith.addi %0, %arg1 : i32
    %c0_i32 = arith.constant 0 : i32
    %c0_i32_0 = arith.constant 0 : i32
    return %1, %c0_i32 : i32, i32
  }
  func.func @transform_1(%arg0: i32, %arg1: i32) -> (i32, i32) {
    %c1_i32 = arith.constant 1 : i32
    %0 = arith.muli %arg0, %c1_i32 : i32
    %1 = arith.addi %0, %arg1 : i32
    %c0_i32 = arith.constant 0 : i32
    %c0_i32_0 = arith.constant 0 : i32
    return %1, %c0_i32 : i32, i32
  }
  func.func @transform_2(%arg0: i32, %arg1: i32) -> (i32, i32) {
    %c0_i32 = arith.constant 0 : i32
    %c0_i32_0 = arith.constant 0 : i32
    return %arg0, %c0_i32 : i32, i32
  }
}

</mosaic_0001>

<bundles_post_ra>
// kernel: tpu_custom_call.1
= control target key start
LH: loop header
LB: loop body
LE: loop exit
PB: predicated region body
PF: predicated region fallthrough
CT: control target
= control target key end

     0   :  { %7 = vsyncpa [#allocation3], 0  ;;  %s199_s0 = inlined_call_operand.hbm [shape: f32[8,256], index: 0, kind: input, shape index: {}]   ;;  %s200_s1 = inlined_call_operand.hbm [shape: f32[8,256], index: 1, kind: input, shape index: {}]   ;;  %s201_s2 = inlined_call_operand.hbm [shape: f32[8,256], index: 2, kind: output, shape index: {}]  }
   0x1   :  { %8 = vsyncpa [#allocation6], 0 }
   0x2   :  { %9 = vsyncpa [#allocation4], 0  ;;  %s19_s11 = sshll.u32 %s199_s0, 4  ;;  %s172_s12 = smov [#allocation2]   ;;  %s20_s11 = int_to_ptr.hbm [resolvable:$true] %s19_s11 }
   0x3   :  { %s21_s13 = sshll.u32 %s172_s12, 4  ;;  %s34_s16 = sshll.u32 %s200_s1, 4  ;;  %s22_s13 = int_to_ptr.vmem [resolvable:$true] %s21_s13  ;;  %s35_s16 = int_to_ptr.hbm [resolvable:$true] %s34_s16 }
   0x4   :  { %24 = dma.hbm_to_vmem [thread:$0]  %s20_s11, 256, %s22_s13, [#allocation3]  }
   0x5   :  { %s173_s17 = smov [#allocation5]  }
   0x6   :  { %s36_s18 = sshll.u32 %s173_s17, 4  ;;  %s37_s18 = int_to_ptr.vmem [resolvable:$true] %s36_s18 }
   0x7   :  { %39 = dma.hbm_to_vmem [thread:$0]  %s35_s16, 256, %s37_s18, [#allocation6]  }
   0x8   :  { %166 = dma.done.wait [#allocation3], 256  }
   0x9   :  { %167 = vsyncadd [#allocation3], 4294967040 }
   0xa   :  { %168 = dma.done.wait [#allocation6], 256  }
   0xb   :  { %169 = vsyncadd [#allocation6], 4294967040  ;;  %v56_v0 = vld [vmem:[#allocation2] sm:$0xff]  ;;  %v58_v1 = vld [vmem:[#allocation5] sm:$0xff]  ;;  %s174_s0 = smov [#allocation7]   ;;  %s79_s21 = sshll.u32 %s201_s2, 4  ;;  %s80_s21 = int_to_ptr.hbm [resolvable:$true] %s79_s21 }
   0xc   :  { %v57_v2 = vld [vmem:[#allocation2 + $0x8] sm:$0xff]  ;;  %v60_v3 = vsub.f32 %v56_v0, %v58_v1  ;;  %v59_v4 = vld [vmem:[#allocation5 + $0x8] sm:$0xff]  ;;  %s77_s19 = sshll.u32 %s174_s0, 4  ;;  %s78_s19 = int_to_ptr.vmem [resolvable:$true] %s77_s19 }
   0xd   :  { %v61_v5 = vsub.f32 %v57_v2, %v59_v4 }
   0xe   :  { %v62_v6 = vmul.f32 %v60_v3, %v60_v3 }
   0xf   :  { %v63_v7 = vmul.f32 %v61_v5, %v61_v5 }
  0x10   :  { %70 = vst [vmem:[#allocation7] sm:$0xff] %v62_v6 }
  0x11   :  { %71 = vst [vmem:[#allocation7 + $0x8] sm:$0xff] %v63_v7 }
  0x12   :  { %82 = dma.vmem_to_hbm [thread:$0]  %s78_s19, 256, %s80_s21, [#allocation4]  }
  0x13   :  { %170 = dma.done.wait [#allocation4], 256  }
  0x14   :  { %171 = vsyncadd [#allocation4], 4294967040 }
  0x15   :  { %87 = vsyncpa [#allocation3], 1 }
  0x16   :  { %88 = vsyncpa [#allocation6], 1 }
  0x17   :  { %89 = vsyncpa [#allocation4], 1 }

</bundles_post_ra>
